<compile_context>
chip_gen: v7x
topology: tpu7x:2x2x1
jax: 0.10.0
libtpu: 0.0.40
codegen_flags: <defaults>
</compile_context>

<pallas_src>
import jax
import jax.numpy as jnp
from jax.experimental import pallas as pl
from jax.experimental.pallas import tpu as pltpu


def _mil_fused_kernel(h_ref, w_ref, b_ref, ww_ref, bw_ref, y_ref, a_ref):
  """One grid step == one bag.  All class heads fused into one wide matmul.

  h_ref : (N, L)          f32   instance features of this bag
  w_ref : (L, 2*C*D + C)  bf16  [Wv_0..Wv_{C-1} | Wu_0..Wu_{C-1} | wc_0..wc_{C-1}]
  b_ref : (1, 2*C*D)      f32   [bv_0..bv_{C-1} | bu_0..bu_{C-1}]
  ww_ref: (1, C*D)        f32   attention_weights[c].weight, class-major
  bw_ref: (1, C)          f32   attention_weights[c].bias
  y_ref : (1, C)          f32   per-class bag logits
  a_ref : (N, C)          f32   per-class attention (softmax over N, axis 0)
  """
  _, cd = ww_ref.shape          # C*D
  _, c = bw_ref.shape           # num_classes
  d = cd // c

  h = h_ref[...]                                          # (N, L) f32

  # ONE wide MXU matmul for all classes, both gates and the folded classifier
  # (bf16 inputs, f32 accumulation).
  z = jnp.dot(h.astype(jnp.bfloat16), w_ref[...],
              preferred_element_type=jnp.float32)         # (N, 2*C*D + C)

  # Gated attention features: single tanh, single sigmoid, single multiply.
  zg = z[:, :2 * cd] + b_ref[...]                         # (N, 2*C*D)
  gated = jnp.tanh(zg[:, :cd]) * jax.nn.sigmoid(zg[:, cd:])   # (N, C*D)

  # All C logits as one (N, C) block (per-class lane reduction over D).
  weighted = gated * ww_ref[...]                          # (N, C*D)
  logit_cols = [
      jnp.sum(weighted[:, i * d:(i + 1) * d], axis=-1, keepdims=True)
      for i in range(c)                                   # static unroll, C tiny
  ]
  logits = jnp.concatenate(logit_cols, axis=-1) + bw_ref[...]   # (N, C)

  # One softmax over the bag axis for every class at once (f32 throughout).
  m = jnp.max(logits, axis=0, keepdims=True)              # (1, C)
  p = jnp.exp(logits - m)                                 # (N, C)
  attn = p / jnp.sum(p, axis=0, keepdims=True)            # (N, C)

  # Folded classifier: Y_c = sum_n attn[n, c] * (H @ wc_c)[n].
  z_cls = z[:, 2 * cd:]                                   # (N, C)
  y_ref[...] = jnp.sum(attn * z_cls, axis=0, keepdims=True)   # (1, C)
  a_ref[...] = attn                                       # (N, C)


@jax.jit
def multi_head_gated_attention_mil(H, Wv, bv, Wu, bu, ww, bw, wc):
  """H: (B, N, L) bags of instance features (module forward == B=1).

  Returns (Y (B, C), A_all (B, C, N)).
  """
  B, N, L = H.shape
  C, _, D = Wv.shape
  CD = C * D

  # Fused weight slab (wrapper-level layout plumbing; in production this is
  # packed once at load time, not per call):
  #   columns [Wv_0..Wv_{C-1} | Wu_0..Wu_{C-1} | wc_0..wc_{C-1}]  (bf16)
  wv_cols = jnp.transpose(Wv, (1, 0, 2)).reshape(L, CD)          # (L, C*D)
  wu_cols = jnp.transpose(Wu, (1, 0, 2)).reshape(L, CD)          # (L, C*D)
  wc_cols = jnp.transpose(wc[:, 0, :], (1, 0))                   # (L, C)
  w_slab = jnp.concatenate([wv_cols, wu_cols, wc_cols],
                           axis=1).astype(jnp.bfloat16)          # (L, 2*C*D + C)

  b_slab = jnp.concatenate([bv[:, 0, :].reshape(1, CD),
                            bu[:, 0, :].reshape(1, CD)], axis=1)  # (1, 2*C*D)
  ww_flat = ww[:, 0, :].reshape(1, CD)                            # (1, C*D)
  bw_row = bw[:, 0, 0].reshape(1, C)                              # (1, C)

  y, a = pl.pallas_call(
      _mil_fused_kernel,
      out_shape=(
          jax.ShapeDtypeStruct((B, 1, C), jnp.float32),
          jax.ShapeDtypeStruct((B, N, C), jnp.float32),
      ),
      grid_spec=pltpu.PrefetchScalarGridSpec(
          num_scalar_prefetch=0,
          grid=(B,),                                       # one step per bag
          in_specs=[
              # Per-bag instance features (bag dim squeezed in the kernel).
              pl.BlockSpec((None, N, L), lambda b: (b, 0, 0)),
              # Weight slab & co.: constant block index -> DMA'd once,
              # VMEM-resident across all bags.
              pl.BlockSpec((L, 2 * CD + C), lambda b: (0, 0)),
              pl.BlockSpec((1, 2 * CD), lambda b: (0, 0)),
              pl.BlockSpec((1, CD), lambda b: (0, 0)),
              pl.BlockSpec((1, C), lambda b: (0, 0)),
          ],
          out_specs=[
              pl.BlockSpec((None, 1, C), lambda b: (b, 0, 0)),   # Y
              pl.BlockSpec((None, N, C), lambda b: (b, 0, 0)),   # attention
          ],
      ),
      compiler_params=pltpu.CompilerParams(
          # Multi-bag: split bags across TensorCores (v7x). Single bag: do not
          # shard one sub-microsecond step.
          dimension_semantics=("parallel",) if B > 1 else ("arbitrary",)),
  )(H, w_slab, b_slab, ww_flat, bw_row)

  Y = y[:, 0, :]                                           # (B, C)
  A_all = jnp.transpose(a, (0, 2, 1))                      # (B, C, N)
  return Y, A_all


def _reference(H, Wv, bv, Wu, bu, ww, bw, wc, matmul_dtype=jnp.float32):
  """Pure-JAX reference mirroring the PyTorch forward (eval mode).

  matmul_dtype=bfloat16 matches the kernel's matmul operand precision (f32
  accumulation everywhere); matmul_dtype=float32 is the torch-faithful path.
  """
  B = H.shape[0]
  C = Wv.shape[0]
  hp = jax.lax.Precision.HIGHEST
  Ys, As = [], []
  for b in range(B):
    h = H[b]
    hm = h.astype(matmul_dtype)
    yb, ab = [], []
    for i in range(C):
      pre_v = jnp.dot(hm, Wv[i].astype(matmul_dtype),
                      preferred_element_type=jnp.float32, precision=hp) + bv[i, 0]
      pre_u = jnp.dot(hm, Wu[i].astype(matmul_dtype),
                      preferred_element_type=jnp.float32, precision=hp) + bu[i, 0]
      gated = jnp.tanh(pre_v) * jax.nn.sigmoid(pre_u)              # (N, D)
      logit = jnp.sum(gated * ww[i, 0][None, :], axis=-1) + bw[i, 0, 0]  # (N,)
      A = jax.nn.softmax(logit)                                    # (N,)
      z_cls = jnp.dot(hm, wc[i, 0].astype(matmul_dtype),
                      preferred_element_type=jnp.float32, precision=hp)  # (N,)
      yb.append(jnp.sum(A * z_cls))        # == (A @ H) @ wc (pooling commutes)
      ab.append(A)
    Ys.append(jnp.stack(yb))
    As.append(jnp.stack(ab))
  return jnp.stack(Ys), jnp.stack(As)


if __name__ == "__main__":
  # Shapes consistent with the module: L=512, D=128, num_classes=2, a bag of
  # N=8 instances; B=2 bags to exercise the resident-slab bag grid (the torch
  # forward corresponds to B=1).
  L, D, C, N, B = 512, 128, 2, 8, 2

  key = jax.random.PRNGKey(0)
  ks = jax.random.split(key, 8)

  # Instance features (output of the ResNet18 backbone, viewed back per bag).
  H = jax.random.normal(ks[0], (B, N, L), dtype=jnp.float32)

  # Deterministic parameter init (PyTorch-Linear-like uniform scaling).
  def u(k, shape, fan_in):
    bnd = 1.0 / jnp.sqrt(fan_in)
    return jax.random.uniform(k, shape, jnp.float32, -bnd, bnd)

  Wv = u(ks[1], (C, L, D), L)      # attention_V[i].weight^T  (stored as L x D)
  bv = u(ks[2], (C, 1, D), L)      # attention_V[i].bias
  Wu = u(ks[3], (C, L, D), L)      # attention_U[i].weight^T
  bu = u(ks[4], (C, 1, D), L)      # attention_U[i].bias
  ww = u(ks[5], (C, 1, D), D)      # attention_weights[i].weight
  bw = u(ks[6], (C, 1, 1), D)      # attention_weights[i].bias
  wc = u(ks[7], (C, 1, L), L)      # classifiers[i].weight (bias=False)

  Y, A_all = multi_head_gated_attention_mil(H, Wv, bv, Wu, bu, ww, bw, wc)
  Y = jax.block_until_ready(Y)
  A_all = jax.block_until_ready(A_all)

  assert Y.shape == (B, C) and A_all.shape == (B, C, N)

  # Tight check: precision-matched (bf16 matmul operands, f32 accumulation).
  Y_m, A_m = _reference(H, Wv, bv, Wu, bu, ww, bw, wc, matmul_dtype=jnp.bfloat16)
  assert jnp.allclose(Y, Y_m, atol=1e-3, rtol=1e-3)
  assert jnp.allclose(A_all, A_m, atol=1e-4, rtol=1e-3)
  assert jnp.allclose(jnp.sum(A_all, axis=-1), 1.0, atol=1e-5)

  # Explicit f32 parity check vs. the torch-faithful math: bounds the bf16
  # projection/classifier deviation from the original f32 module.
  Y_f, A_f = _reference(H, Wv, bv, Wu, bu, ww, bw, wc, matmul_dtype=jnp.float32)
  assert jnp.allclose(Y, Y_f, atol=5e-2, rtol=5e-2)
  assert jnp.allclose(A_all, A_f, atol=5e-2)

  print("KERNEL_OK")
</pallas_src>

<mosaic_0001>
module attributes {stable_mosaic.version = 11 : i64} {
  func.func @_mil_fused_kernel(%arg0: i32, %arg1: memref<1x8x512xf32, #tpu.memory_space<vmem>>, %arg2: memref<512x514xbf16, #tpu.memory_space<vmem>>, %arg3: memref<1x512xf32, #tpu.memory_space<vmem>>, %arg4: memref<1x256xf32, #tpu.memory_space<vmem>>, %arg5: memref<1x2xf32, #tpu.memory_space<vmem>>, %arg6: memref<1x1x2xf32, #tpu.memory_space<vmem>>, %arg7: memref<1x8x2xf32, #tpu.memory_space<vmem>>) attributes {dimension_semantics = [#tpu.dimension_semantics<parallel>], iteration_bounds = array<i64: 2>, scalar_prefetch = 0 : i64, scratch_operands = 0 : i64, tpu.core_type = #tpu.core_type<tc>, window_params = [{transform_indices = @transform_0, window_bounds = array<i64: 1, 8, 512>}, {pipeline_mode = #tpu.pipeline_mode<synchronous>, transform_indices = @transform_1, window_bounds = array<i64: 512, 514>}, {pipeline_mode = #tpu.pipeline_mode<synchronous>, transform_indices = @transform_2, window_bounds = array<i64: 1, 512>}, {pipeline_mode = #tpu.pipeline_mode<synchronous>, transform_indices = @transform_3, window_bounds = array<i64: 1, 256>}, {pipeline_mode = #tpu.pipeline_mode<synchronous>, transform_indices = @transform_4, window_bounds = array<i64: 1, 2>}, {transform_indices = @transform_5, window_bounds = array<i64: 1, 1, 2>}, {transform_indices = @transform_6, window_bounds = array<i64: 1, 8, 2>}]} {
    %c0 = arith.constant 0 : index
    %c0_0 = arith.constant 0 : index
    %c0_1 = arith.constant 0 : index
    %0 = vector.load %arg1[%c0, %c0_0, %c0_1] : memref<1x8x512xf32, #tpu.memory_space<vmem>>, vector<1x8x512xf32>
    %1 = vector.shape_cast %0 : vector<1x8x512xf32> to vector<8x512xf32>
    %2 = arith.truncf %1 : vector<8x512xf32> to vector<8x512xbf16>
    %c0_2 = arith.constant 0 : index
    %c0_3 = arith.constant 0 : index
    %3 = vector.load %arg2[%c0_2, %c0_3] : memref<512x514xbf16, #tpu.memory_space<vmem>>, vector<512x514xbf16>
    %cst = arith.constant dense<0.000000e+00> : vector<8x514xf32>
    %4 = tpu.matmul %2, %3, %cst {dimension_numbers = #tpu.dot_dimension_numbers<[1], [0], [0], [1], [0, 0, 1, 1], [], []>} : vector<8x512xbf16>, vector<512x514xbf16>, vector<8x514xf32> -> vector<8x514xf32>
    %5 = vector.extract_strided_slice %4 {offsets = [0, 0], sizes = [8, 512], strides = [1, 1]} : vector<8x514xf32> to vector<8x512xf32>
    %c0_4 = arith.constant 0 : index
    %c0_5 = arith.constant 0 : index
    %6 = vector.load %arg3[%c0_4, %c0_5] : memref<1x512xf32, #tpu.memory_space<vmem>>, vector<1x512xf32>
    %7 = vector.broadcast %6 : vector<1x512xf32> to vector<8x512xf32>
    %8 = arith.addf %5, %7 : vector<8x512xf32>
    %9 = vector.extract_strided_slice %8 {offsets = [0, 0], sizes = [8, 256], strides = [1, 1]} : vector<8x512xf32> to vector<8x256xf32>
    %10 = math.tanh %9 : vector<8x256xf32>
    %11 = vector.extract_strided_slice %8 {offsets = [0, 256], sizes = [8, 256], strides = [1, 1]} : vector<8x512xf32> to vector<8x256xf32>
    %12 = arith.negf %11 : vector<8x256xf32>
    %13 = math.exp %12 : vector<8x256xf32>
    %cst_6 = arith.constant 1.000000e+00 : f32
    %14 = vector.broadcast %cst_6 : f32 to vector<8x256xf32>
    %15 = arith.addf %14, %13 : vector<8x256xf32>
    %16 = arith.divf %14, %15 : vector<8x256xf32>
    %17 = arith.mulf %10, %16 : vector<8x256xf32>
    %c0_7 = arith.constant 0 : index
    %c0_8 = arith.constant 0 : index
    %18 = vector.load %arg4[%c0_7, %c0_8] : memref<1x256xf32, #tpu.memory_space<vmem>>, vector<1x256xf32>
    %19 = vector.broadcast %18 : vector<1x256xf32> to vector<8x256xf32>
    %20 = arith.mulf %17, %19 : vector<8x256xf32>
    %21 = vector.extract_strided_slice %20 {offsets = [0, 0], sizes = [8, 128], strides = [1, 1]} : vector<8x256xf32> to vector<8x128xf32>
    %cst_9 = arith.constant dense<0.000000e+00> : vector<8xf32>
    %22 = vector.multi_reduction <add>, %21, %cst_9 [1] : vector<8x128xf32> to vector<8xf32>
    %23 = vector.shape_cast %22 : vector<8xf32> to vector<8x1xf32>
    %24 = vector.extract_strided_slice %20 {offsets = [0, 128], sizes = [8, 128], strides = [1, 1]} : vector<8x256xf32> to vector<8x128xf32>
    %cst_10 = arith.constant dense<0.000000e+00> : vector<8xf32>
    %25 = vector.multi_reduction <add>, %24, %cst_10 [1] : vector<8x128xf32> to vector<8xf32>
    %26 = vector.shape_cast %25 : vector<8xf32> to vector<8x1xf32>
    %27 = tpu.concatenate %23, %26 in 1 : vector<8x1xf32>, vector<8x1xf32> -> vector<8x2xf32>
    %c0_11 = arith.constant 0 : index
    %c0_12 = arith.constant 0 : index
    %28 = vector.load %arg5[%c0_11, %c0_12] : memref<1x2xf32, #tpu.memory_space<vmem>>, vector<1x2xf32>
    %29 = vector.broadcast %28 : vector<1x2xf32> to vector<8x2xf32>
    %30 = arith.addf %27, %29 : vector<8x2xf32>
    %cst_13 = arith.constant dense<0xFF800000> : vector<2xf32>
    %31 = vector.multi_reduction <maximumf>, %30, %cst_13 [0] : vector<8x2xf32> to vector<2xf32>
    %32 = vector.shape_cast %31 : vector<2xf32> to vector<1x2xf32>
    %33 = vector.broadcast %32 : vector<1x2xf32> to vector<8x2xf32>
    %34 = arith.subf %30, %33 : vector<8x2xf32>
    %35 = math.exp %34 : vector<8x2xf32>
    %cst_14 = arith.constant dense<0.000000e+00> : vector<2xf32>
    %36 = vector.multi_reduction <add>, %35, %cst_14 [0] : vector<8x2xf32> to vector<2xf32>
    %37 = vector.shape_cast %36 : vector<2xf32> to vector<1x2xf32>
    %38 = vector.broadcast %37 : vector<1x2xf32> to vector<8x2xf32>
    %39 = arith.divf %35, %38 : vector<8x2xf32>
    %40 = vector.extract_strided_slice %4 {offsets = [0, 512], sizes = [8, 2], strides = [1, 1]} : vector<8x514xf32> to vector<8x2xf32>
    %41 = arith.mulf %39, %40 : vector<8x2xf32>
    %cst_15 = arith.constant dense<0.000000e+00> : vector<2xf32>
    %42 = vector.multi_reduction <add>, %41, %cst_15 [0] : vector<8x2xf32> to vector<2xf32>
    %43 = vector.shape_cast %42 : vector<2xf32> to vector<1x2xf32>
    %c0_16 = arith.constant 0 : index
    %c0_17 = arith.constant 0 : index
    %c0_18 = arith.constant 0 : index
    %44 = vector.load %arg6[%c0_16, %c0_17, %c0_18] : memref<1x1x2xf32, #tpu.memory_space<vmem>>, vector<1x1x2xf32>
    %45 = vector.shape_cast %44 : vector<1x1x2xf32> to vector<1x2xf32>
    %46 = vector.shape_cast %43 : vector<1x2xf32> to vector<1x1x2xf32>
    tpu.vector_store %arg6[%c0_16, %c0_17, %c0_18], %46 {strides = array<i32>} : memref<1x1x2xf32, #tpu.memory_space<vmem>>, vector<1x1x2xf32>,
    %c0_19 = arith.constant 0 : index
    %c0_20 = arith.constant 0 : index
    %c0_21 = arith.constant 0 : index
    %47 = vector.load %arg7[%c0_19, %c0_20, %c0_21] : memref<1x8x2xf32, #tpu.memory_space<vmem>>, vector<1x8x2xf32>
    %48 = vector.shape_cast %47 : vector<1x8x2xf32> to vector<8x2xf32>
    %49 = vector.shape_cast %39 : vector<8x2xf32> to vector<1x8x2xf32>
    tpu.vector_store %arg7[%c0_19, %c0_20, %c0_21], %49 {strides = array<i32>} : memref<1x8x2xf32, #tpu.memory_space<vmem>>, vector<1x8x2xf32>,
    return
  }
  func.func @transform_0(%arg0: i32) -> (i32, i32, i32) {
    %c0_i32 = arith.constant 0 : i32
    %c0_i32_0 = arith.constant 0 : i32
    %c0_i32_1 = arith.constant 0 : i32
    return %arg0, %c0_i32, %c0_i32_0 : i32, i32, i32
  }
  func.func @transform_1(%arg0: i32) -> (i32, i32) {
    %c0_i32 = arith.constant 0 : i32
    %c0_i32_0 = arith.constant 0 : i32
    %c0_i32_1 = arith.constant 0 : i32
    return %c0_i32, %c0_i32_0 : i32, i32
  }
  func.func @transform_2(%arg0: i32) -> (i32, i32) {
    %c0_i32 = arith.constant 0 : i32
    %c0_i32_0 = arith.constant 0 : i32
    %c0_i32_1 = arith.constant 0 : i32
    return %c0_i32, %c0_i32_0 : i32, i32
  }
  func.func @transform_3(%arg0: i32) -> (i32, i32) {
    %c0_i32 = arith.constant 0 : i32
    %c0_i32_0 = arith.constant 0 : i32
    %c0_i32_1 = arith.constant 0 : i32
    return %c0_i32, %c0_i32_0 : i32, i32
  }
  func.func @transform_4(%arg0: i32) -> (i32, i32) {
    %c0_i32 = arith.constant 0 : i32
    %c0_i32_0 = arith.constant 0 : i32
    %c0_i32_1 = arith.constant 0 : i32
    return %c0_i32, %c0_i32_0 : i32, i32
  }
  func.func @transform_5(%arg0: i32) -> (i32, i32, i32) {
    %c0_i32 = arith.constant 0 : i32
    %c0_i32_0 = arith.constant 0 : i32
    %c0_i32_1 = arith.constant 0 : i32
    return %arg0, %c0_i32, %c0_i32_0 : i32, i32, i32
  }
  func.func @transform_6(%arg0: i32) -> (i32, i32, i32) {
    %c0_i32 = arith.constant 0 : i32
    %c0_i32_0 = arith.constant 0 : i32
    %c0_i32_1 = arith.constant 0 : i32
    return %arg0, %c0_i32, %c0_i32_0 : i32, i32, i32
  }
}

</mosaic_0001>

<bundles_post_ra>
// kernel: multi_head_gated_attention_mil.1
= control target key start
LH: loop header
LB: loop body
LE: loop exit
PB: predicated region body
PF: predicated region fallthrough
CT: control target
= control target key end

     0   :  { %12 = vsyncpa [#allocation3], 0  ;;  %s2960_s0 = inlined_call_operand.vmem [shape: f32[2,8,512], index: 0, kind: input, shape index: {}]   ;;  %s2961_s1 = inlined_call_operand.vmem [shape: bf16[512,514], index: 1, kind: input, shape index: {}]   ;;  %s2962_s2 = inlined_call_operand.vmem [shape: f32[1,512], index: 2, kind: input, shape index: {}]   ;;  %s2963_s3 = inlined_call_operand.vmem [shape: f32[1,256], index: 3, kind: input, shape index: {}]   ;;  %s2964_s4 = inlined_call_operand.vmem [shape: f32[1,2], index: 4, kind: input, shape index: {}]   ;;  %s2965_s5 = inlined_call_operand.hbm [shape: f32[2,1,2], index: 5, kind: output, shape index: {0}]   ;;  %s2966_s6 = inlined_call_operand.vmem [shape: f32[2,8,2], index: 6, kind: output, shape index: {1}]  }
   0x1   :  { %14 = vsyncpa [#allocation3 + $0x1], 0  ;;  %s2334_s21 = smov 0   ;;  %s2336_s22 = smov 0  }
   0x2   :  { %s2338_s23 = smov 0   ;;  %s2340_s24 = smov 0  }
   0x3 LB: > { %s2355_s25 = sadd.s32 4294967295, %s2296_s24   ;;  %s1737_s26 = sadd.s32 4294967294, %s2296_s24   ;;  %s2296_s24 = sphi %s2340_s24, %s2972_s24   ;;  %s2292_s23 = sphi %s2338_s23, %s2971_s23   ;;  %s2288_s22 = sphi %s2336_s22, %s2970_s22   ;;  %s2284_s21 = sphi %s2334_s21, %s2969_s21  }
   0x4   : > { %s2359_s27 = sadd.s32 1, %s2296_s24   ;;  %s137_s28 = sadd.s32 1, %s2292_s23 }
   0x5   : > { %s134_s29 = ssub.s32 %s2296_s24, %s2359_s27  ;;  %p147_p0 = scmp.ne.s32.totalorder %s2292_s23, %s2288_s22 }
   0x6   : > { %p135_p1 = scmp.eq.s32.totalorder %s134_s29, 0  ;;  %p148_p2 = scmp.eq.s32.totalorder %s2355_s25, 1 }
   0x7   : > { %p153_p3 = scmp.ne.s32.totalorder %s2288_s22, %s2284_s21  ;;  %p154_p4 = scmp.eq.s32.totalorder %s1737_s26, 1 }
   0x8   : > { %s2370_s30 = scalar_select %p135_p1, %s2292_s23, %s137_s28  }
   0x9   : > { %p2372_p5 = por %p148_p2, %p147_p0  ;;  %p2376_p6 = por %p154_p4, %p153_p3 }
   0xa   : > { %p1740_p7 = scmp.ge.s32.totalorder %s2296_s24, 1  ;;  %p218_p8 = scmp.lt.s32.totalorder %s2296_s24, 3 }
   0xc   : > { %p219_p9 = pnand %p1740_p7, %p218_p8 }
   0xd   : > { %v1994_v0 = vld [vmem:[%s2961_s1 + $0x4] ss:$20 sps:$4 sm:$0xff] (!%p219_p9)   ;;  %v1998_v2 = vld [vmem:[%s2961_s1] ss:$20 sps:$4 sm:$0xff] (!%p219_p9)   ;;  %v2004_v6 = vld [vmem:[%s2961_s1 + $0x28] ss:$20 sps:$4 sm:$0xff] (!%p219_p9)  }
   0xe   : > { %222 = sbr.rel (%p219_p9) target bundleno = 621 (0x26d), region = 40  ;;  %v1996_v1 = vld [vmem:[%s2961_s1 + $0x284] ss:$20 sps:$4 sm:$0xff] (!%p219_p9)   ;;  %1293 = vmatprep.subr.bf16.mxu0 (!%p219_p9), %v1994_v0  ;;  %v1999_v3 = vld [vmem:[%s2961_s1 + $0x280] ss:$20 sps:$4 sm:$0xff] (!%p219_p9)   ;;  %p251_p10 = scmp.lt.s32.totalorder (!%p219_p9), %s2355_s25, 1 }
   0xf   : > { %1334 = vmatprep.subr.bf16.mxu1 (!%p219_p9), %v1996_v1  ;;  %v2000_v4 = vld [vmem:[%s2961_s1 + $0x2c] ss:$20 sps:$4 sm:$0xff] (!%p219_p9)   ;;  %1294 = vmatpush1.bf16.msra.mxu0 (!%p219_p9), %v1998_v2  ;;  %v2005_v7 = vld [vmem:[%s2961_s1 + $0x2a8] ss:$20 sps:$4 sm:$0xff] (!%p219_p9)   ;;  %v2010_v10 = vld [vmem:[%s2961_s1 + $0x50] ss:$20 sps:$4 sm:$0xff] (!%p219_p9)  }
  0x10   : > { %1335 = vmatpush1.bf16.msra.mxu1 (!%p219_p9), %v1999_v3  ;;  %v2002_v5 = vld [vmem:[%s2961_s1 + $0x2ac] ss:$20 sps:$4 sm:$0xff] (!%p219_p9)   ;;  %1295 = vmatprep.subr.bf16.mxu0 (!%p219_p9), %v2000_v4  ;;  %v2006_v8 = vld [vmem:[%s2961_s1 + $0x54] ss:$20 sps:$4 sm:$0xff] (!%p219_p9)   ;;  %v2011_v11 = vld [vmem:[%s2961_s1 + $0x2d0] ss:$20 sps:$4 sm:$0xff] (!%p219_p9)  }
  0x11   : > { %1336 = vmatprep.subr.bf16.mxu1 (!%p219_p9), %v2002_v5  ;;  %v2008_v9 = vld [vmem:[%s2961_s1 + $0x2d4] ss:$20 sps:$4 sm:$0xff] (!%p219_p9)   ;;  %v2012_v12 = vld [vmem:[%s2961_s1 + $0x7c] ss:$20 sps:$4 sm:$0xff] (!%p219_p9)   ;;  %v2016_v14 = vld [vmem:[%s2961_s1 + $0x78] ss:$20 sps:$4 sm:$0xff] (!%p219_p9)  }
  0x12   : > { %v2014_v13 = vld [vmem:[%s2961_s1 + $0x2fc] ss:$20 sps:$4 sm:$0xff] (!%p219_p9)   ;;  %v2017_v15 = vld [vmem:[%s2961_s1 + $0x2f8] ss:$20 sps:$4 sm:$0xff] (!%p219_p9)   ;;  %v2022_v18 = vld [vmem:[%s2961_s1 + $0xa0] ss:$20 sps:$4 sm:$0xff] (!%p219_p9)  }
  0x13   : > { %1296 = vmatpush1.bf16.msra.mxu0 (!%p219_p9), %v2004_v6  ;;  %v2018_v16 = vld [vmem:[%s2961_s1 + $0xa4] ss:$20 sps:$4 sm:$0xff] (!%p219_p9)   ;;  %v2023_v19 = vld [vmem:[%s2961_s1 + $0x320] ss:$20 sps:$4 sm:$0xff] (!%p219_p9)   ;;  %v2028_v22 = vld [vmem:[%s2961_s1 + $0xc8] ss:$20 sps:$4 sm:$0xff] (!%p219_p9)  }
  0x14   : > { %1337 = vmatpush1.bf16.msra.mxu1 (!%p219_p9), %v2005_v7  ;;  %1297 = vmatprep.subr.bf16.mxu0 (!%p219_p9), %v2006_v8  ;;  %v2020_v17 = vld [vmem:[%s2961_s1 + $0x324] ss:$20 sps:$4 sm:$0xff] (!%p219_p9)   ;;  %v2024_v20 = vld [vmem:[%s2961_s1 + $0xcc] ss:$20 sps:$4 sm:$0xff] (!%p219_p9)   ;;  %v2029_v23 = vld [vmem:[%s2961_s1 + $0x348] ss:$20 sps:$4 sm:$0xff] (!%p219_p9)  }
  0x15   : > { %1338 = vmatprep.subr.bf16.mxu1 %v2008_v9  ;;  %v2026_v21 = vld [vmem:[%s2961_s1 + $0x34c] ss:$20 sps:$4 sm:$0xff]   ;;  %v2030_v24 = vld [vmem:[%s2961_s1 + $0xf4] ss:$20 sps:$4 sm:$0xff]   ;;  %v2034_v26 = vld [vmem:[%s2961_s1 + $0xf0] ss:$20 sps:$4 sm:$0xff]  }
  0x16   : > { %v2032_v25 = vld [vmem:[%s2961_s1 + $0x374] ss:$20 sps:$4 sm:$0xff]   ;;  %v2035_v27 = vld [vmem:[%s2961_s1 + $0x370] ss:$20 sps:$4 sm:$0xff]   ;;  %v2040_v30 = vld [vmem:[%s2961_s1 + $0x118] ss:$20 sps:$4 sm:$0xff]  }
  0x17   : > { %1298 = vmatpush1.bf16.msra.mxu0 %v2010_v10  ;;  %v2036_v28 = vld [vmem:[%s2961_s1 + $0x11c] ss:$20 sps:$4 sm:$0xff]   ;;  %v2041_v31 = vld [vmem:[%s2961_s1 + $0x398] ss:$20 sps:$4 sm:$0xff]   ;;  %v2046_v34 = vld [vmem:[%s2961_s1 + $0x140] ss:$20 sps:$4 sm:$0xff]  }
  0x18   : > { %1339 = vmatpush1.bf16.msra.mxu1 %v2011_v11  ;;  %1299 = vmatprep.subr.bf16.mxu0 %v2012_v12  ;;  %v2038_v29 = vld [vmem:[%s2961_s1 + $0x39c] ss:$20 sps:$4 sm:$0xff]   ;;  %v2042_v32 = vld [vmem:[%s2961_s1 + $0x144] ss:$20 sps:$4 sm:$0xff]   ;;  %v2047_v35 = vld [vmem:[%s2961_s1 + $0x3c0] ss:$20 sps:$4 sm:$0xff]  }
  0x19   : > { %1340 = vmatprep.subr.bf16.mxu1 %v2014_v13  ;;  %v2044_v33 = vld [vmem:[%s2961_s1 + $0x3c4] ss:$20 sps:$4 sm:$0xff]   ;;  %v2048_v36 = vld [vmem:[%s2961_s1 + $0x16c] ss:$20 sps:$4 sm:$0xff]   ;;  %s2495_s29 = scalar_select %p251_p10, %s2355_s25, 1  ;;  %vm1597_vm0 = vcmask 7168  }
  0x1a   : > { %v2050_v37 = vld [vmem:[%s2961_s1 + $0x3ec] ss:$20 sps:$4 sm:$0xff]   ;;  %v2052_v38 = vld [vmem:[%s2961_s1 + $0x168] ss:$20 sps:$4 sm:$0xff]   ;;  %v2058_v42 = vld [vmem:[%s2961_s1 + $0x190] ss:$20 sps:$4 sm:$0xff]  }
  0x1b   : > { %1300 = vmatpush1.bf16.msra.mxu0 %v2016_v14  ;;  %v2053_v39 = vld [vmem:[%s2961_s1 + $0x3e8] ss:$20 sps:$4 sm:$0xff]   ;;  %s1910_s17 = sshll.u32 %s2495_s29, 5  ;;  %v2059_v43 = vld [vmem:[%s2961_s1 + $0x410] ss:$20 sps:$4 sm:$0xff]   ;;  %vm1607_vm1 = vcmask 15360  }
  0x1c   : > { %1341 = vmatpush1.bf16.msra.mxu1 %v2017_v15  ;;  %1301 = vmatprep.subr.bf16.mxu0 %v2018_v16  ;;  %v2054_v40 = vld [vmem:[%s2961_s1 + $0x194] ss:$20 sps:$4 sm:$0xff]   ;;  %s2522_s12 = scalar_lea.vmem %s2960_s0, %s1910_s17  ;;  %v2060_v44 = vld [vmem:[%s2961_s1 + $0x1bc] ss:$20 sps:$4 sm:$0xff]   ;;  %v2064_v47 = vld [vmem:[%s2961_s1 + $0x1b8] ss:$20 sps:$4 sm:$0xff]  }
  0x1d   : > { %1342 = vmatprep.subr.bf16.mxu1 %v2020_v17  ;;  %v2056_v41 = vld [vmem:[%s2961_s1 + $0x414] ss:$20 sps:$4 sm:$0xff]   ;;  %v2062_v45 = vld [vmem:[%s2961_s1 + $0x43c] ss:$20 sps:$4 sm:$0xff]   ;;  %v2065_v48 = vld [vmem:[%s2961_s1 + $0x438] ss:$20 sps:$4 sm:$0xff]  }
  0x1e   : > { %v262_v46 = vld [vmem:[%s2522_s12 + $0x8] sm:$0xff]  ;;  %v264_v50 = vld [vmem:[%s2522_s12 + $0x18] sm:$0xff]  ;;  %v2070_v54 = vld [vmem:[%s2961_s1 + $0x1e0] ss:$20 sps:$4 sm:$0xff]   ;;  %s1743_s16 = sshll.u32 %s2495_s29, 3  ;;  %s1907_s20 = sshll.u32 %s2355_s25, 4 }
  0x1f   : > { %1302 = vmatpush1.bf16.msra.mxu0 %v2022_v18  ;;  %v2537_v49 = vpack.c.bf16 %v262_v46, %v262_v46  ;;  %v2066_v51 = vld [vmem:[%s2961_s1 + $0x1e4] ss:$20 sps:$4 sm:$0xff]   ;;  %v2543_v52 = vpack.c.bf16 %v264_v50, %v264_v50  ;;  %v2071_v55 = vld [vmem:[%s2961_s1 + $0x460] ss:$20 sps:$4 sm:$0xff]   ;;  %v2076_v58 = vld [vmem:[%s2961_s1 + $0x208] ss:$20 sps:$4 sm:$0xff]   ;;  %s259_s17 = scalar_lea.vmem %s2966_s6, %s1743_s16  ;;  %s2918_s10 = scalar_lea.hbm %s2965_s5, %s1907_s20 }
  0x20   : > { %1343 = vmatpush1.bf16.msra.mxu1 %v2023_v19  ;;  %1303 = vmatprep.subr.bf16.mxu0 %v2024_v20  ;;  %v2068_v53 = vld [vmem:[%s2961_s1 + $0x464] ss:$20 sps:$4 sm:$0xff]   ;;  %v2072_v56 = vld [vmem:[%s2961_s1 + $0x20c] ss:$20 sps:$4 sm:$0xff]   ;;  %v2077_v59 = vld [vmem:[%s2961_s1 + $0x488] ss:$20 sps:$4 sm:$0xff]  }
  0x21   : > { %1344 = vmatprep.subr.bf16.mxu1 %v2026_v21  ;;  %1325 = vmatprep.mubr.bf16.mxu0 %v2537_v49  ;;  %v2074_v57 = vld [vmem:[%s2961_s1 + $0x48c] ss:$20 sps:$4 sm:$0xff]   ;;  %v2078_v60 = vld [vmem:[%s2961_s1 + $0x234] ss:$20 sps:$4 sm:$0xff]   ;;  %v2082_v62 = vld [vmem:[%s2961_s1 + $0x230] ss:$20 sps:$4 sm:$0xff]  }
  0x22   : > { %1366 = vmatprep.mubr.bf16.mxu1 %v2543_v52  ;;  %v2080_v61 = vld [vmem:[%s2961_s1 + $0x4b4] ss:$20 sps:$4 sm:$0xff]   ;;  %v2083_v63 = vld [vmem:[%s2961_s1 + $0x4b0] ss:$20 sps:$4 sm:$0xff]   ;;  %v2088_v2 = vld [vmem:[%s2961_s1 + $0x258] ss:$20 sps:$4 sm:$0xff]  }
  0x23   : > { %1304 = vmatpush1.bf16.msra.mxu0 %v2028_v22  ;;  %v2084_v0 = vld [vmem:[%s2961_s1 + $0x25c] ss:$20 sps:$4 sm:$0xff]   ;;  %v2089_v3 = vld [vmem:[%s2961_s1 + $0x4d8] ss:$20 sps:$4 sm:$0xff]   ;;  %v261_v4 = vld [vmem:[%s2522_s12] sm:$0xff]  ;;  %vm1635_vm2 = vcmask 8192  }
  0x24   : > { %1345 = vmatpush1.bf16.msra.mxu1 %v2029_v23  ;;  %1305 = vmatprep.subr.bf16.mxu0 %v2030_v24  ;;  %v2086_v1 = vld [vmem:[%s2961_s1 + $0x4dc] ss:$20 sps:$4 sm:$0xff]   ;;  %v2092_v6 = vld [vmem:[%s2961_s1 + $0xc] ss:$20 sps:$4 sm:$0xff]   ;;  %v2600_v8 = vpack.c.bf16 %v261_v4, %v261_v4  ;;  %v2098_v12 = vld [vmem:[%s2961_s1 + $0x34] ss:$20 sps:$4 sm:$0xff]  }
  0x25   : > { %1346 = vmatprep.subr.bf16.mxu1 %v2032_v25  ;;  %v263_v5 = vld [vmem:[%s2522_s12 + $0x10] sm:$0xff]  ;;  %v2095_v7 = vld [vmem:[%s2961_s1 + $0x28c] ss:$20 sps:$4 sm:$0xff]   ;;  %v2090_v10 = vld [vmem:[%s2961_s1 + $0x8] ss:$20 sps:$4 sm:$0xff]   ;;  %s243_s12 = sand.u32 1, %s2288_s22  }
  0x26   : > { %v2602_v9 = vpack.c.bf16 %v263_v5, %v263_v5  ;;  %v2093_v11 = vld [vmem:[%s2961_s1 + $0x288] ss:$20 sps:$4 sm:$0xff]   ;;  %v2096_v14 = vld [vmem:[%s2961_s1 + $0x30] ss:$20 sps:$4 sm:$0xff]   ;;  %v2102_v18 = vld [vmem:[%s2961_s1 + $0x58] ss:$20 sps:$4 sm:$0xff]  }
  0x27   : > { %1306 = vmatpush1.bf16.msra.mxu0 %v2034_v26  ;;  %v2101_v13 = vld [vmem:[%s2961_s1 + $0x2b4] ss:$20 sps:$4 sm:$0xff]   ;;  %v2099_v15 = vld [vmem:[%s2961_s1 + $0x2b0] ss:$20 sps:$4 sm:$0xff]   ;;  %v2105_v19 = vld [vmem:[%s2961_s1 + $0x2d8] ss:$20 sps:$4 sm:$0xff]  }
  0x28   : > { %1347 = vmatpush1.bf16.msra.mxu1 %v2035_v27  ;;  %1307 = vmatprep.subr.bf16.mxu0 %v2036_v28  ;;  %v2104_v16 = vld [vmem:[%s2961_s1 + $0x5c] ss:$20 sps:$4 sm:$0xff]   ;;  %v2110_v20 = vld [vmem:[%s2961_s1 + $0x84] ss:$20 sps:$4 sm:$0xff]   ;;  %v2108_v22 = vld [vmem:[%s2961_s1 + $0x80] ss:$20 sps:$4 sm:$0xff]  }
  0x29   : > { %1348 = vmatprep.subr.bf16.mxu1 %v2038_v29  ;;  %v2107_v17 = vld [vmem:[%s2961_s1 + $0x2dc] ss:$20 sps:$4 sm:$0xff]   ;;  %v2113_v21 = vld [vmem:[%s2961_s1 + $0x304] ss:$20 sps:$4 sm:$0xff]   ;;  %v2111_v23 = vld [vmem:[%s2961_s1 + $0x300] ss:$20 sps:$4 sm:$0xff]  }
  0x2a   : > { %v2116_v24 = vld [vmem:[%s2961_s1 + $0xac] ss:$20 sps:$4 sm:$0xff]   ;;  %v2114_v26 = vld [vmem:[%s2961_s1 + $0xa8] ss:$20 sps:$4 sm:$0xff]   ;;  %v2144_v46 = vld [vmem:[%s2961_s1 + $0x170] ss:$20 sps:$4 sm:$0xff]  }
  0x2b   : > { %1308 = vmatpush1.bf16.msra.mxu0 %v2040_v30  ;;  %v2119_v25 = vld [vmem:[%s2961_s1 + $0x32c] ss:$20 sps:$4 sm:$0xff]   ;;  %v2117_v27 = vld [vmem:[%s2961_s1 + $0x328] ss:$20 sps:$4 sm:$0xff]   ;;  %v2120_v30 = vld [vmem:[%s2961_s1 + $0xd0] ss:$20 sps:$4 sm:$0xff]  }
  0x2c   : > { %1349 = vmatpush1.bf16.msra.mxu1 %v2041_v31  ;;  %1309 = vmatprep.subr.bf16.mxu0 %v2042_v32  ;;  %v2122_v28 = vld [vmem:[%s2961_s1 + $0xd4] ss:$20 sps:$4 sm:$0xff]   ;;  %v2123_v31 = vld [vmem:[%s2961_s1 + $0x350] ss:$20 sps:$4 sm:$0xff]   ;;  %v2174_v4 = vld [vmem:[%s2961_s1 + $0x238] ss:$20 sps:$4 sm:$0xff]  }
  0x2d   : > { %1350 = vmatprep.subr.bf16.mxu1 %v2044_v33  ;;  %v2125_v29 = vld [vmem:[%s2961_s1 + $0x354] ss:$20 sps:$4 sm:$0xff]   ;;  %v2128_v32 = vld [vmem:[%s2961_s1 + $0xfc] ss:$20 sps:$4 sm:$0xff]   ;;  %v2177_v5 = vld [vmem:[%s2961_s1 + $0x4b8] ss:$20 sps:$4 sm:$0xff]  }
  0x2e   : > { %v2131_v33 = vld [vmem:[%s2961_s1 + $0x37c] ss:$20 sps:$4 sm:$0xff]   ;;  %s244_s26 = scalar_lea.vmem [#allocation2], %s243_s12  ;;  %s1639_s11 = scalar_lea.sflag [#allocation3], %s243_s12 }
  0x2f   : > { %1310 = vmatpush1.bf16.msra.mxu0 %v2046_v34  ;;  %v2126_v34 = vld [vmem:[%s2961_s1 + $0xf8] ss:$20 sps:$4 sm:$0xff]   ;;  %v2155_v50 = vld [vmem:[%s2961_s1 + $0x41c] ss:$20 sps:$4 sm:$0xff]   ;;  %s1655_s29 = sshll.u32 %s244_s26, 4  ;;  %s2298_s25 = smov [#allocation2]   ;;  %s2920_s29 = int_to_ptr.vmem [resolvable:$true] %s1655_s29 }
  0x30   : > { %1351 = vmatpush1.bf16.msra.mxu1 %v2047_v35  ;;  %1311 = vmatprep.subr.bf16.mxu0 %v2048_v36  ;;  %v2129_v35 = vld [vmem:[%s2961_s1 + $0x378] ss:$20 sps:$4 sm:$0xff]   ;;  %s2234_s13 = scalar_lea.vmem %s2920_s29, 16  ;;  %s2238_s14 = sshll.u32 %s2298_s25, 4  ;;  %s2239_s14 = int_to_ptr.vmem [resolvable:$false] %s2238_s14 }
  0x31   : > { %1352 = vmatprep.subr.bf16.mxu1 %v2050_v37  ;;  %v2134_v36 = vld [vmem:[%s2961_s1 + $0x124] ss:$20 sps:$4 sm:$0xff]   ;;  %p2235_p11 = scmp.ne.s32.totalorder %s2920_s29, %s2234_s13  ;;  %s2240_s15 = scalar_lea.vmem %s2239_s14, 32 }
  0x32   : > { %v2137_v37 = vld [vmem:[%s2961_s1 + $0x3a4] ss:$20 sps:$4 sm:$0xff]   ;;  %p2241_p0 = scmp.lt.s32.totalorder %s2920_s29, %s2239_s14  ;;  %p2242_p1 = scmp.lt.s32.totalorder %s2240_s15, %s2234_s13 }
  0x33   : > { %1312 = vmatpush1.bf16.msra.mxu0 %v2052_v38  ;;  %v2132_v38 = vld [vmem:[%s2961_s1 + $0x120] ss:$20 sps:$4 sm:$0xff]   ;;  %p2236_p12 = pnand %p2235_p11, %p2372_p5 }
  0x34   : > { %1353 = vmatpush1.bf16.msra.mxu1 %v2053_v39  ;;  %1313 = vmatprep.subr.bf16.mxu0 %v2054_v40  ;;  %v2135_v39 = vld [vmem:[%s2961_s1 + $0x3a0] ss:$20 sps:$4 sm:$0xff]   ;;  %p2243_p2 = por %p2242_p1, %p2241_p0 }
  0x35   : > { %1354 = vmatprep.subr.bf16.mxu1 %v2056_v41  ;;  %v2140_v40 = vld [vmem:[%s2961_s1 + $0x14c] ss:$20 sps:$4 sm:$0xff]   ;;  %p2237_p13 = pneg %p2236_p12 }
  0x36   : > { %v2143_v41 = vld [vmem:[%s2961_s1 + $0x3cc] ss:$20 sps:$4 sm:$0xff]  }
  0x37   : > { %1314 = vmatpush1.bf16.msra.mxu0 %v2058_v42  ;;  %v2138_v42 = vld [vmem:[%s2961_s1 + $0x148] ss:$20 sps:$4 sm:$0xff]   ;;  %p2244_p3 = pnand %p2243_p2, %p2237_p13 }
  0x38   : > { %1355 = vmatpush1.bf16.msra.mxu1 %v2059_v43  ;;  %1315 = vmatprep.subr.bf16.mxu0 %v2060_v44  ;;  %v2141_v43 = vld [vmem:[%s2961_s1 + $0x3c8] ss:$20 sps:$4 sm:$0xff]  }
  0x39   : > { %1356 = vmatprep.subr.bf16.mxu1 %v2062_v45  ;;  %v2146_v44 = vld [vmem:[%s2961_s1 + $0x174] ss:$20 sps:$4 sm:$0xff]  }
  0x3a   : > { %v2149_v45 = vld [vmem:[%s2961_s1 + $0x3f4] ss:$20 sps:$4 sm:$0xff]  }
  0x3b   : > { %1316 = vmatpush1.bf16.msra.mxu0 %v2064_v47  ;;  %v2147_v47 = vld [vmem:[%s2961_s1 + $0x3f0] ss:$20 sps:$4 sm:$0xff]  }
  0x3c   : > { %1357 = vmatpush1.bf16.msra.mxu1 %v2065_v48  ;;  %1317 = vmatprep.subr.bf16.mxu0 %v2066_v51  ;;  %v2152_v48 = vld [vmem:[%s2961_s1 + $0x19c] ss:$20 sps:$4 sm:$0xff]   ;;  %v2150_v51 = vld [vmem:[%s2961_s1 + $0x198] ss:$20 sps:$4 sm:$0xff]  }
  0x3d   : > { %1358 = vmatprep.subr.bf16.mxu1 %v2068_v53  ;;  %v2153_v53 = vld [vmem:[%s2961_s1 + $0x418] ss:$20 sps:$4 sm:$0xff]  }
  0x3f   : > { %1318 = vmatpush1.bf16.msra.mxu0 %v2070_v54  ;;  %v2158_v54 = vld [vmem:[%s2961_s1 + $0x1c4] ss:$20 sps:$4 sm:$0xff]  }
  0x40   : > { %1359 = vmatpush1.bf16.msra.mxu1 %v2071_v55  ;;  %1319 = vmatprep.subr.bf16.mxu0 %v2072_v56  ;;  %v2161_v55 = vld [vmem:[%s2961_s1 + $0x444] ss:$20 sps:$4 sm:$0xff]   ;;  %v2156_v56 = vld [vmem:[%s2961_s1 + $0x1c0] ss:$20 sps:$4 sm:$0xff]  }
  0x41   : > { %1360 = vmatprep.subr.bf16.mxu1 %v2074_v57  ;;  %v2159_v57 = vld [vmem:[%s2961_s1 + $0x440] ss:$20 sps:$4 sm:$0xff]  }
  0x43   : > { %1320 = vmatpush1.bf16.msra.mxu0 %v2076_v58  ;;  %v2164_v58 = vld [vmem:[%s2961_s1 + $0x1ec] ss:$20 sps:$4 sm:$0xff]  }
  0x44   : > { %1361 = vmatpush1.bf16.msra.mxu1 %v2077_v59  ;;  %1321 = vmatprep.subr.bf16.mxu0 %v2078_v60  ;;  %v2167_v59 = vld [vmem:[%s2961_s1 + $0x46c] ss:$20 sps:$4 sm:$0xff]   ;;  %v2162_v60 = vld [vmem:[%s2961_s1 + $0x1e8] ss:$20 sps:$4 sm:$0xff]  }
  0x45   : > { %1362 = vmatprep.subr.bf16.mxu1 %v2080_v61  ;;  %v2165_v61 = vld [vmem:[%s2961_s1 + $0x468] ss:$20 sps:$4 sm:$0xff]  }
  0x47   : > { %1322 = vmatpush1.bf16.msra.mxu0 %v2082_v62  ;;  %v2170_v62 = vld [vmem:[%s2961_s1 + $0x214] ss:$20 sps:$4 sm:$0xff]  }
  0x48   : > { %1363 = vmatpush1.bf16.msra.mxu1 %v2083_v63  ;;  %1323 = vmatprep.subr.bf16.mxu0 %v2084_v0  ;;  %v2173_v63 = vld [vmem:[%s2961_s1 + $0x494] ss:$20 sps:$4 sm:$0xff]   ;;  %v2168_v0 = vld [vmem:[%s2961_s1 + $0x210] ss:$20 sps:$4 sm:$0xff]  }
  0x49   : > { %1364 = vmatprep.subr.bf16.mxu1 %v2086_v1  ;;  %v2171_v1 = vld [vmem:[%s2961_s1 + $0x490] ss:$20 sps:$4 sm:$0xff]  }
  0x4b   : > { %1324 = vmatpush1.bf16.msra.mxu0 %v2088_v2  ;;  %v2176_v2 = vld [vmem:[%s2961_s1 + $0x23c] ss:$20 sps:$4 sm:$0xff]  }
  0x4c   : > { %1365 = vmatpush1.bf16.msra.mxu1 %v2089_v3  ;;  %1375 = vmatprep.subr.bf16.mxu0 %v2092_v6  ;;  %v2179_v3 = vld [vmem:[%s2961_s1 + $0x4bc] ss:$20 sps:$4 sm:$0xff]   ;;  %v2182_v6 = vld [vmem:[%s2961_s1 + $0x264] ss:$20 sps:$4 sm:$0xff]  }
  0x4d   : > { %1416 = vmatprep.subr.bf16.mxu1 %v2095_v7  ;;  %v2185_v7 = vld [vmem:[%s2961_s1 + $0x4e4] ss:$20 sps:$4 sm:$0xff]  }
  0x4e   : > { %1326 = vmatmul.mubr.bf16.vlgmr.msra.gmra.mrb[0].mxu0 %v2600_v8 }
  0x4f   : > { %1367 = vmatmul.mubr.bf16.vlgmr.msra.gmra.mrb[0].mxu1 %v2602_v9  ;;  %1376 = vmatpush1.bf16.msra.mxu0 %v2090_v10  ;;  %v2180_v10 = vld [vmem:[%s2961_s1 + $0x260] ss:$20 sps:$4 sm:$0xff]  }
  0x50   : > { %1417 = vmatpush1.bf16.msra.mxu1 %v2093_v11  ;;  %1377 = vmatprep.subr.bf16.mxu0 %v2098_v12  ;;  %v2183_v11 = vld [vmem:[%s2961_s1 + $0x4e0] ss:$20 sps:$4 sm:$0xff]   ;;  %v2186_v12 = vld [vmem:[%s2961_s1 + $0x150] ss:$20 sps:$4 sm:$0xff]  }
  0x51   : > { %1418 = vmatprep.subr.bf16.mxu1 %v2101_v13  ;;  %1407 = vmatprep.mubr.bf16.mxu0 %v2537_v49  ;;  %v2187_v13 = vld [vmem:[%s2961_s1 + $0x3d0] ss:$20 sps:$4 sm:$0xff]  }
  0x52   : > { %1448 = vmatprep.mubr.bf16.mxu1 %v2543_v52 }
  0x53   : > { %1378 = vmatpush1.bf16.msra.mxu0 %v2096_v14  ;;  %v2188_v14 = vld [vmem:[%s2961_s1 + $0x10] ss:$20 sps:$4 sm:$0xff]  }
  0x54   : > { %1419 = vmatpush1.bf16.msra.mxu1 %v2099_v15  ;;  %1379 = vmatprep.subr.bf16.mxu0 %v2104_v16  ;;  %v2189_v15 = vld [vmem:[%s2961_s1 + $0x290] ss:$20 sps:$4 sm:$0xff]   ;;  %v2192_v16 = vld [vmem:[%s2961_s1 + $0x38] ss:$20 sps:$4 sm:$0xff]  }
  0x55   : > { %1420 = vmatprep.subr.bf16.mxu1 %v2107_v17  ;;  %v2193_v17 = vld [vmem:[%s2961_s1 + $0x2b8] ss:$20 sps:$4 sm:$0xff]  }
  0x57   : > { %1380 = vmatpush1.bf16.msra.mxu0 %v2102_v18  ;;  %v2194_v18 = vld [vmem:[%s2961_s1 + $0x1a0] ss:$20 sps:$4 sm:$0xff]  }
  0x58   : > { %1421 = vmatpush1.bf16.msra.mxu1 %v2105_v19  ;;  %1381 = vmatprep.subr.bf16.mxu0 %v2110_v20  ;;  %v2195_v19 = vld [vmem:[%s2961_s1 + $0x420] ss:$20 sps:$4 sm:$0xff]  }
  0x59   : > { %1422 = vmatprep.subr.bf16.mxu1 %v2113_v21  ;;  %v2196_v20 = vld [vmem:[%s2961_s1 + $0x60] ss:$20 sps:$4 sm:$0xff]  }
  0x5a   : > { %v2197_v21 = vld [vmem:[%s2961_s1 + $0x2e0] ss:$20 sps:$4 sm:$0xff]  }
  0x5b   : > { %1382 = vmatpush1.bf16.msra.mxu0 %v2108_v22  ;;  %v2198_v22 = vld [vmem:[%s2961_s1 + $0x1c8] ss:$20 sps:$4 sm:$0xff]  }
  0x5c   : > { %1423 = vmatpush1.bf16.msra.mxu1 %v2111_v23  ;;  %1383 = vmatprep.subr.bf16.mxu0 %v2116_v24  ;;  %v2199_v23 = vld [vmem:[%s2961_s1 + $0x448] ss:$20 sps:$4 sm:$0xff]  }
  0x5d   : > { %1424 = vmatprep.subr.bf16.mxu1 %v2119_v25  ;;  %v2200_v24 = vld [vmem:[%s2961_s1 + $0x88] ss:$20 sps:$4 sm:$0xff]  }
  0x5e   : > { %v2201_v25 = vld [vmem:[%s2961_s1 + $0x308] ss:$20 sps:$4 sm:$0xff]  }
  0x5f   : > { %1384 = vmatpush1.bf16.msra.mxu0 %v2114_v26  ;;  %v2202_v26 = vld [vmem:[%s2961_s1 + $0x1f0] ss:$20 sps:$4 sm:$0xff]  }
  0x60   : > { %1425 = vmatpush1.bf16.msra.mxu1 %v2117_v27  ;;  %1385 = vmatprep.subr.bf16.mxu0 %v2122_v28  ;;  %v2203_v27 = vld [vmem:[%s2961_s1 + $0x470] ss:$20 sps:$4 sm:$0xff]  }
  0x61   : > { %1426 = vmatprep.subr.bf16.mxu1 %v2125_v29  ;;  %v2204_v28 = vld [vmem:[%s2961_s1 + $0xb0] ss:$20 sps:$4 sm:$0xff]  }
  0x62   : > { %v2205_v29 = vld [vmem:[%s2961_s1 + $0x330] ss:$20 sps:$4 sm:$0xff]  }
  0x63   : > { %1386 = vmatpush1.bf16.msra.mxu0 %v2120_v30  ;;  %v2206_v30 = vld [vmem:[%s2961_s1 + $0x218] ss:$20 sps:$4 sm:$0xff]  }
  0x64   : > { %1427 = vmatpush1.bf16.msra.mxu1 %v2123_v31  ;;  %1387 = vmatprep.subr.bf16.mxu0 %v2128_v32  ;;  %v2207_v31 = vld [vmem:[%s2961_s1 + $0x498] ss:$20 sps:$4 sm:$0xff]  }
  0x65   : > { %1428 = vmatprep.subr.bf16.mxu1 %v2131_v33  ;;  %v2208_v32 = vld [vmem:[%s2961_s1 + $0xd8] ss:$20 sps:$4 sm:$0xff]  }
  0x66   : > { %v2209_v33 = vld [vmem:[%s2961_s1 + $0x358] ss:$20 sps:$4 sm:$0xff]  }
  0x67   : > { %1388 = vmatpush1.bf16.msra.mxu0 %v2126_v34  ;;  %v2210_v34 = vld [vmem:[%s2961_s1 + $0x240] ss:$20 sps:$4 sm:$0xff]  }
  0x68   : > { %1429 = vmatpush1.bf16.msra.mxu1 %v2129_v35  ;;  %1389 = vmatprep.subr.bf16.mxu0 %v2134_v36  ;;  %v2211_v35 = vld [vmem:[%s2961_s1 + $0x4c0] ss:$20 sps:$4 sm:$0xff]  }
  0x69   : > { %1430 = vmatprep.subr.bf16.mxu1 %v2137_v37  ;;  %v2212_v36 = vld [vmem:[%s2961_s1 + $0x100] ss:$20 sps:$4 sm:$0xff]  }
  0x6a   : > { %v2213_v37 = vld [vmem:[%s2961_s1 + $0x380] ss:$20 sps:$4 sm:$0xff]  }
  0x6b   : > { %1390 = vmatpush1.bf16.msra.mxu0 %v2132_v38  ;;  %v2214_v38 = vld [vmem:[%s2961_s1 + $0x268] ss:$20 sps:$4 sm:$0xff]  }
  0x6c   : > { %1431 = vmatpush1.bf16.msra.mxu1 %v2135_v39  ;;  %1391 = vmatprep.subr.bf16.mxu0 %v2140_v40  ;;  %v2215_v39 = vld [vmem:[%s2961_s1 + $0x4e8] ss:$20 sps:$4 sm:$0xff]  }
  0x6d   : > { %1432 = vmatprep.subr.bf16.mxu1 %v2143_v41  ;;  %v2216_v40 = vld [vmem:[%s2961_s1 + $0x128] ss:$20 sps:$4 sm:$0xff]  }
  0x6e   : > { %v2217_v41 = vld [vmem:[%s2961_s1 + $0x3a8] ss:$20 sps:$4 sm:$0xff]  }
  0x6f   : > { %1392 = vmatpush1.bf16.msra.mxu0 %v2138_v42 }
  0x70   : > { %1433 = vmatpush1.bf16.msra.mxu1 %v2141_v43  ;;  %1393 = vmatprep.subr.bf16.mxu0 %v2146_v44 }
  0x71   : > { %1434 = vmatprep.subr.bf16.mxu1 %v2149_v45 }
  0x73   : > { %1394 = vmatpush1.bf16.msra.mxu0 %v2144_v46 }
  0x74   : > { %1435 = vmatpush1.bf16.msra.mxu1 %v2147_v47  ;;  %1395 = vmatprep.subr.bf16.mxu0 %v2152_v48 }
  0x75   : > { %1436 = vmatprep.subr.bf16.mxu1 %v2155_v50 }
  0x77   : > { %1396 = vmatpush1.bf16.msra.mxu0 %v2150_v51 }
  0x78   : > { %1437 = vmatpush1.bf16.msra.mxu1 %v2153_v53  ;;  %1397 = vmatprep.subr.bf16.mxu0 %v2158_v54  ;;  %v1539_v54 = vlaneseq }
  0x79   : > { %1438 = vmatprep.subr.bf16.mxu1 %v2161_v55 }
  0x7a   : > { %v1540_v55 = vshrl.u32 %v1539_v54, 7 }
  0x7b   : > { %1398 = vmatpush1.bf16.msra.mxu0 %v2156_v56 }
  0x7c   : > { %1439 = vmatpush1.bf16.msra.mxu1 %v2159_v57  ;;  %1399 = vmatprep.subr.bf16.mxu0 %v2164_v58  ;;  %v1549_v56 = vsub.s32 2, %v1540_v55  ;;  %v1553_v57 = vsub.s32 3, %v1540_v55 }
  0x7d   : > { %1440 = vmatprep.subr.bf16.mxu1 %v2167_v59 }
  0x7f   : > { %1400 = vmatpush1.bf16.msra.mxu0 %v2162_v60 }
  0x80   : > { %1441 = vmatpush1.bf16.msra.mxu1 %v2165_v61  ;;  %1401 = vmatprep.subr.bf16.mxu0 %v2170_v62 }
  0x81   : > { %1442 = vmatprep.subr.bf16.mxu1 %v2173_v63 }
  0x83   : > { %1402 = vmatpush1.bf16.msra.mxu0 %v2168_v0 }
  0x84   : > { %1443 = vmatpush1.bf16.msra.mxu1 %v2171_v1  ;;  %1403 = vmatprep.subr.bf16.mxu0 %v2176_v2 }
  0x85   : > { %1444 = vmatprep.subr.bf16.mxu1 %v2179_v3 }
  0x87   : > { %1404 = vmatpush1.bf16.msra.mxu0 %v2174_v4 }
  0x88   : > { %1445 = vmatpush1.bf16.msra.mxu1 %v2177_v5  ;;  %1405 = vmatprep.subr.bf16.mxu0 %v2182_v6 }
  0x89   : > { %1446 = vmatprep.subr.bf16.mxu1 %v2185_v7 }
  0x8b   : > { %1406 = vmatpush1.bf16.msra.mxu0 %v2180_v10  ;;  %v1541_v10 = vsub.s32 0, %v1540_v55 }
  0x8c   : > { %1447 = vmatpush1.bf16.msra.mxu1 %v2183_v11  ;;  %1911 = vmatprep.subr.bf16.mxu0 %v2186_v12  ;;  %v1545_v12 = vsub.s32 1, %v1540_v55 }
  0x8d   : > { %1933 = vmatprep.subr.bf16.mxu1 %v2187_v13 }
  0x8e   : > { %1408 = vmatmul.mubr.bf16.vlgmr.msra.gmra.mrb[4].mxu0 %v2600_v8 }
  0x8f   : > { %1449 = vmatmul.mubr.bf16.vlgmr.msra.gmra.mrb[4].mxu1 %v2602_v9  ;;  %1489 = vmatprep.mubr.bf16.mxu0 %v2537_v49  ;;  %v2190_v49 = vld [vmem:[%s2961_s1 + $0x178] ss:$20 sps:$4 sm:$0xff]  }
  0x90   : > { %1529 = vmatprep.mubr.bf16.mxu1 %v2543_v52  ;;  %v2191_v52 = vld [vmem:[%s2961_s1 + $0x3f8] ss:$20 sps:$4 sm:$0xff]   ;;  %1912 = vmatpush3.bf16.msra.mxu0 %v2188_v14 }
  0x91   : > { %1934 = vmatpush3.bf16.msra.mxu1 %v2189_v15  ;;  %1913 = vmatprep.subr.bf16.mxu0 %v2190_v49 }
  0x92   : > { %1935 = vmatprep.subr.bf16.mxu1 %v2191_v52 }
  0x94   : > { %1914 = vmatpush3.bf16.msra.mxu0 %v2192_v16 }
  0x95   : > { %1936 = vmatpush3.bf16.msra.mxu1 %v2193_v17  ;;  %1915 = vmatprep.subr.bf16.mxu0 %v2194_v18 }
  0x96   : > { %1937 = vmatprep.subr.bf16.mxu1 %v2195_v19  ;;  %v1579_v19 = vld [vmem:[%s2963_s3] sm:$0x3] }
  0x98   : > { %1916 = vmatpush3.bf16.msra.mxu0 %v2196_v20 }
  0x99   : > { %1938 = vmatpush3.bf16.msra.mxu1 %v2197_v21  ;;  %1917 = vmatprep.subr.bf16.mxu0 %v2198_v22  ;;  %v1584_v22 = vrot.slane %v1579_v19, %v1541_v10 }
  0x9a   : > { %1939 = vmatprep.subr.bf16.mxu1 %v2199_v23 }
  0x9c   : > { %1918 = vmatpush3.bf16.msra.mxu0 %v2200_v24 }
  0x9d   : > { %1940 = vmatpush3.bf16.msra.mxu1 %v2201_v25  ;;  %1919 = vmatprep.subr.bf16.mxu0 %v2202_v26 }
  0x9e   : > { %1941 = vmatprep.subr.bf16.mxu1 %v2203_v27 }
  0xa0   : > { %1920 = vmatpush3.bf16.msra.mxu0 %v2204_v28  ;;  %v1588_v28 = vrot.slane %v1579_v19, %v1545_v12 }
  0xa1   : > { %1942 = vmatpush3.bf16.msra.mxu1 %v2205_v29  ;;  %1921 = vmatprep.subr.bf16.mxu0 %v2206_v30 }
  0xa2   : > { %1943 = vmatprep.subr.bf16.mxu1 %v2207_v31 }
  0xa4   : > { %1922 = vmatpush3.bf16.msra.mxu0 %v2208_v32 }
  0xa5   : > { %1944 = vmatpush3.bf16.msra.mxu1 %v2209_v33  ;;  %1923 = vmatprep.subr.bf16.mxu0 %v2210_v34 }
  0xa6   : > { %1945 = vmatprep.subr.bf16.mxu1 %v2211_v35 }
  0xa8   : > { %1924 = vmatpush3.bf16.msra.mxu0 %v2212_v36 }
  0xa9   : > { %1946 = vmatpush3.bf16.msra.mxu1 %v2213_v37  ;;  %1925 = vmatprep.subr.bf16.mxu0 %v2214_v38 }
  0xaa   : > { %1947 = vmatprep.subr.bf16.mxu1 %v2215_v39 }
  0xac   : > { %1926 = vmatpush3.bf16.msra.mxu0 %v2216_v40 }
  0xad   : > { %1948 = vmatpush3.bf16.msra.mxu1 %v2217_v41 }
  0xaf   : > { %1490 = vmatmul.mubr.bf16.vlgmr.msra.gmra.mrb[8].mxu0 %v2600_v8  ;;  %v1537_v8 = vld [vmem:[%s2962_s2] sm:$0xf] }
  0xb0   : > { %1530 = vmatmul.mubr.bf16.vlgmr.msra.gmra.mrb[8].mxu1 %v2602_v9  ;;  %v1550_v58 = vrot.slane %v1537_v8, %v1549_v56  ;;  %v1554_v60 = vrot.slane %v1537_v8, %v1553_v57  ;;  %v1542_v13 = vrot.slane %v1537_v8, %v1541_v10  ;;  %v1546_v14 = vrot.slane %v1537_v8, %v1545_v12 }
 0x121   : > { %v1327_v42 = vpop.f32.mrb[0].mxu0 }
 0x122   : > { %v1368_v43 = vpop.f32.mrb[0].mxu1  ;;  %v1329_v45 = vpop.f32.mrb[1].mxu0 }
 0x123   : > { %v1369_v44 = vadd.f32 %v1368_v43, %v1327_v42  ;;  %v1370_v46 = vpop.f32.mrb[1].mxu1  ;;  %v1331_v48 = vpop.f32.mrb[2].mxu0  ;;  %v1906_v42 = vld [vmem:[%s2964_s4] ss:$0 sm:$0xff] }
 0x124   : > { %v1371_v47 = vadd.f32 %v1370_v46, %v1329_v45  ;;  %v1372_v50 = vpop.f32.mrb[2].mxu1  ;;  %v1332_v51 = vpop.f32.mrb[3].mxu0 }
 0x125   : > { %v1373_v53 = vpop.f32.mrb[3].mxu1  ;;  %v1559_v15 = vadd.f32 %v1542_v13, %v1369_v44 }
 0x126   : > { %v1560_v49 = vadd.f32 %v1546_v14, %v1371_v47 }
 0x161   : > { %v1409_v9 = vpop.f32.mrb[4].mxu0 }
 0x162   : > { %v1450_v59 = vpop.f32.mrb[4].mxu1  ;;  %v1411_v62 = vpop.f32.mrb[5].mxu0 }
 0x163   : > { %v1451_v61 = vadd.f32 %v1450_v59, %v1409_v9  ;;  %v1452_v63 = vpop.f32.mrb[5].mxu1  ;;  %v1413_v1 = vpop.f32.mrb[6].mxu0 }
 0x164   : > { %v1453_v0 = vadd.f32 %v1452_v63, %v1411_v62  ;;  %v1454_v2 = vpop.f32.mrb[6].mxu1  ;;  %v1414_v4 = vpop.f32.mrb[7].mxu0 }
 0x165   : > { %v1561_v3 = vadd.f32 %v1550_v58, %v1451_v61  ;;  %v1455_v5 = vpop.f32.mrb[7].mxu1 }
 0x166   : > { %v1562_v6 = vadd.f32 %v1554_v60, %v1453_v0 }
 0x167   : > { %v1904_v7 = vmul.f32 -1.442695, %v1561_v3 }
 0x168   : > { %v1905_v11 = vmul.f32 -1.442695, %v1562_v6 }
 0x169   : > { %2218 = vpow2.f32 %v1904_v7 }
 0x16a   : > { %2220 = vpow2.f32 %v1905_v11 }
 0x16b   : > { %2222 = vtanh.f32 %v1559_v15 }
 0x16c   : > { %2224 = vtanh.f32 %v1560_v49 }
 0x173   : > { %v2219_v52 = vpop.eup %2218 }
 0x174   : > { %v2221_v16 = vpop.eup %2220  ;;  %v1571_v17 = vadd.f32 1.0, %v2219_v52 }
 0x175   : > { %v1572_v18 = vadd.f32 1.0, %v2221_v16  ;;  %v2223_v20 = vpop.eup %2222 }
 0x176   : > { %2226 = vrcp.f32 %v1571_v17  ;;  %v2225_v21 = vpop.eup %2224 }
 0x177   : > { %2228 = vrcp.f32 %v1572_v18 }
 0x180   : > { %v2227_v23 = vpop.eup %2226 }
 0x181   : > { %v2229_v24 = vpop.eup %2228  ;;  %v1577_v25 = vmul.f32 %v2227_v23, %v2223_v20 }
 0x182   : > { %v1578_v26 = vmul.f32 %v2229_v24, %v2225_v21  ;;  %v1927_v30 = vpop.f32.mrb[8].mxu0 }
 0x183   : > { %v1591_v27 = vmul.f32 %v1584_v22, %v1577_v25  ;;  %v1949_v31 = vpop.f32.mrb[8].mxu1  ;;  %v1928_v32 = vpop.f32.mrb[9].mxu0 }
 0x184   : > { %v1592_v29 = vmul.f32 %v1588_v28, %v1578_v26  ;;  %v1950_v33 = vpop.f32.mrb[9].mxu1  ;;  %v1929_v34 = vadd.f32 %v1928_v32, %v1927_v30  ;;  %v1930_v36 = vpop.f32.mrb[10].mxu0 }
 0x185   : > { %1593 = vadd.xlane.f32.xlu0 %v1591_v27  ;;  %v1951_v35 = vadd.f32 %v1950_v33, %v1949_v31  ;;  %v1952_v37 = vpop.f32.mrb[10].mxu1  ;;  %v1931_v38 = vpop.f32.mrb[11].mxu0 }
 0x186   : > { %v1953_v39 = vpop.f32.mrb[11].mxu1 }
 0x187   : > { %v1532_v40 = vadd.f32 %v1951_v35, %v1929_v34 }
 0x189   : > { %1595 = vadd.xlane.f32.xlu0 %v1592_v29 }
 0x212   : > { %v1594_v41 = vpop.xlane.xlu0 %1593 }
 0x216   : > { %v1596_v43 = vpop.xlane.xlu0 %1595 }
 0x217   : > { %v1598_v44 = vsel %vm1597_vm0, %v1594_v41, %v1596_v43 }
 0x218   : > { %v1606_v45 = vadd.f32 %v1906_v42, %v1598_v44 }
 0x21a   : > { %v1608_v46 = vsel %vm1607_vm1, %v1606_v45, -inf }
 0x21b   : > { %v1609_v47 = vrot.slane %v1608_v46, 4 }
 0x21d   : > { %v1610_v48 = vmax.f32 %v1608_v46, %v1609_v47 }
 0x21f   : > { %v1611_v50 = vrot.slane %v1610_v48, 2 }
 0x221   : > { %v1612_v51 = vmax.f32 %v1610_v48, %v1611_v50 }
 0x223   : > { %v1613_v53 = vrot.slane %v1612_v51, 1 }
 0x225   : > { %v1614_v54 = vmax.f32 %v1612_v51, %v1613_v53 }
 0x227   : > { %v1615_v55 = vsub.f32 %v1606_v45, %v1614_v54 }
 0x229   : > { %v1616_v56 = vmul.f32 1.442695, %v1615_v55 }
 0x22b   : > { %2230 = vpow2.f32 %v1616_v56 }
 0x235   : > { %v2231_v57 = vpop.eup %2230 }
 0x236   : > { %v1618_v8 = vsel %vm1607_vm1, %v2231_v57, 0.0 }
 0x237   : > { %v1619_v58 = vrot.slane %v1618_v8, 4 }
 0x239   : > { %v1620_v9 = vadd.f32 %v1619_v58, %v1618_v8 }
 0x23b   : > { %v1621_v59 = vrot.slane %v1620_v9, 2 }
 0x23d   : > { %v1622_v60 = vadd.f32 %v1621_v59, %v1620_v9 }
 0x23f   : > { %v1623_v61 = vrot.slane %v1622_v60, 1 }
 0x241   : > { %v1624_v62 = vadd.f32 %v1623_v61, %v1622_v60 }
 0x243   : > { %2232 = vrcp.f32 %v1624_v62 }
 0x24d   : > { %v2233_v63 = vpop.eup %2232 }
 0x24e   : > { %v1626_v0 = vmul.f32 %v2233_v63, %v2231_v57 }
 0x250   : > { %v1627_v1 = vmul.f32 %v1626_v0, %v1532_v40  ;;  %1637 = vst.msk [vmem:[%s259_s17] sm:$0xff] %vm1607_vm1, %v1626_v0 }
 0x252   : > { %v1628_v2 = vsel %vm1607_vm1, %v1627_v1, 0.0 }
 0x253   : > { %v1629_v3 = vrot.slane %v1628_v2, 4 }
 0x255   : > { %v1630_v4 = vadd.f32 %v1629_v3, %v1628_v2 }
 0x257   : > { %v1631_v5 = vrot.slane %v1630_v4, 2 }
 0x259   : > { %v1632_v6 = vadd.f32 %v1631_v5, %v1630_v4 }
 0x25b   : > { %v1633_v7 = vrot.slane %v1632_v6, 1 }
 0x25d   : > { %v1634_v10 = vadd.f32 %v1633_v7, %v1632_v6 }
 0x25f   : > { %1636 = vst.msk [vmem:[%s244_s26] sm:$0x1] %vm1635_vm2, %v1634_v10 }
 0x260   : > { %2247 = shalt.err (!%p2244_p3)
}
 0x261   : > { %s2248_s16 = scalar_lea.hbm %s2918_s10, 16  ;;  %s2252_s17 = scalar_lea.hbm %s2965_s5, 32 }
 0x262   : > { %p2249_p4 = scmp.ne.s32.totalorder %s2918_s10, %s2248_s16  ;;  %p2253_p9 = scmp.lt.u32.totalorder %s2918_s10, %s2965_s5 }
 0x263   : > { %p2254_p10 = scmp.lt.u32.totalorder %s2252_s17, %s2248_s16  ;;  %p2256_p12 = scmp.lt.u32.totalorder %s2248_s16, %s2918_s10 }
 0x264   : > { %p2250_p7 = pnand %p2249_p4, %p2372_p5 }
 0x265   : > { %p2255_p11 = por %p2254_p10, %p2253_p9 }
 0x266   : > { %p2251_p8 = pneg %p2250_p7 }
 0x267   : > { %p2257_p13 = por %p2256_p12, %p2255_p11 }
 0x269   : > { %p2258_p0 = pnand %p2257_p13, %p2251_p8 }
 0x26b   : > { %2261 = shalt.err (!%p2258_p0)
}
 0x26c   : > { %1955 = dma.vmem_to_hbm [thread:$0]  (%p2372_p5), %s2920_s29, 16, %s2918_s10, %s1639_s11  }
 0x26d PF: > { %p1961_p1 = scmp.ge.s32.totalorder %s2296_s24, 2  ;;  %s1670_s26 = sand.u32 1, %s2284_s21  }
 0x26e   : > { %s1671_s28 = scalar_lea.sflag [#allocation3], %s1670_s26 }
 0x26f   : > { %p1958_p2 = pnand %p1961_p1, %p2376_p6 }
 0x271   : > { %2279 = dma.done.wait (!%p1958_p2), %s1671_s28, 16  }
 0x272   : > { %2281 = vsyncadd (!%p1958_p2), %s1671_s28, 4294967280  ;;  %p17_p3 = scmp.ge.s32.totalorder %s2359_s27, 4   ;;  %s2969_s21 = smov %s2288_s22 }
 0x273   : > { %s2970_s22 = smov %s2292_s23  ;;  %s2971_s23 = smov %s2370_s30 }
 0x274   : > { %s2972_s24 = smov %s2359_s27  ;;  %19 = sbr.rel (!%p17_p3) target bundleno = 3 (0x3), region = 87 }
 0x27b   :  { %1682 = vsyncpa [#allocation3], 1 }
 0x27c   :  { %1684 = vsyncpa [#allocation3 + $0x1], 1 }

</bundles_post_ra>
